<compile_context>
chip_gen: v7x
topology: tpu7x:2x2x1
jax: 0.10.0
libtpu: 0.0.40
codegen_flags: <defaults>
</compile_context>

<pallas_src>
import jax
import jax.numpy as jnp
from jax.experimental import pallas as pl
from jax.experimental.pallas import tpu as pltpu


def _add_pos_kernel(x_ref, pos_ref, o_ref):
    # x_ref: (TB, TC) block of batch rows; pos_ref: (1, TC) shared positional
    # slab (broadcast over TB); o_ref: (TB, TC).
    o_ref[...] = x_ref[...] + pos_ref[...]


def _choose_tiles(B, SE, itemsize, target_tile_bytes):
    """Pick (TB, TC) tile sizes for the (B, S*E) view."""
    # Sublane packing: 8 rows for 4-byte dtypes, 16 for 2-byte, 32 for 1-byte.
    row_align = 8 * max(1, 4 // max(1, itemsize))
    row_bytes = SE * itemsize

    if row_align * row_bytes <= target_tile_bytes:
        # Full-width rows; tile along the batch axis only.
        TC = SE
        tb = target_tile_bytes // max(1, row_bytes)
        if tb >= B:
            TB = B  # single full-extent block along batch (always legal)
        else:
            TB = max(row_align, (tb // row_align) * row_align)
            if TB >= B:
                TB = B
    else:
        # Rows too big for one tile: also tile along the lane (S*E) axis so the
        # tile (and therefore resident VMEM) stays bounded regardless of S*E.
        TB = B if B <= row_align else row_align
        tc = target_tile_bytes // max(1, TB * itemsize)
        TC = max(128, (tc // 128) * 128)  # 128-multiple lane tile
        if TC >= SE:
            TC = SE
    return TB, TC


def learnable_positional_encoding(x, pos_embedding, *,
                                  min_pallas_bytes=1 << 20,
                                  target_tile_bytes=None):
    """x: (B, S, E); pos_embedding: (1, F, E) with S <= F.

    Returns x + pos_embedding[:, :S, :].
    """
    B, S, E = x.shape
    pos = pos_embedding[:, :S, :]  # static slice, exact

    itemsize = x.dtype.itemsize
    total_bytes = B * S * E * itemsize
    if total_bytes < min_pallas_bytes:
        # Tiny input: fused XLA add beats any pallas_call fixed cost.
        return x + pos

    SE = S * E
    x2 = x.reshape(B, SE)        # free: row-major contiguous
    pos2 = pos.reshape(1, SE)

    # Generation-aware sizing.
    try:
        info = pltpu.get_tpu_info()
        vmem_cap = int(getattr(info, "vmem_capacity_bytes", 64 * 1024 * 1024))
    except Exception:
        vmem_cap = 64 * 1024 * 1024  # conservative (v7x per-TC)
    if target_tile_bytes is None:
        # ~VMEM/8 per x tile -> resident ~VMEM/2 with double buffering.
        target_tile_bytes = max(2 << 20, min(16 << 20, vmem_cap // 8))

    TB, TC = _choose_tiles(B, SE, itemsize, target_tile_bytes)

    # Ragged final blocks (B % TB != 0 or SE % TC != 0) are clipped/masked by
    # Pallas; no pad or post-slice HBM passes needed.
    grid = (pl.cdiv(B, TB), pl.cdiv(SE, TC))

    # Resident VMEM: double-buffered x + out tiles + double-buffered pos tile.
    tile_bytes = TB * TC * itemsize
    resident = 2 * 2 * tile_bytes + 2 * TC * itemsize
    vmem_limit = int(min(vmem_cap * 3 // 4, resident + (16 << 20)))
    vmem_limit = int(max(vmem_limit, resident + (2 << 20)))  # never < resident

    out2 = pl.pallas_call(
        _add_pos_kernel,
        out_shape=jax.ShapeDtypeStruct((B, SE), x.dtype),
        grid_spec=pltpu.PrefetchScalarGridSpec(
            num_scalar_prefetch=0,
            grid=grid,
            in_specs=[
                pl.BlockSpec((TB, TC), lambda b, c: (b, c)),  # x rows
                pl.BlockSpec((1, TC), lambda b, c: (0, c)),   # pos (broadcast)
            ],
            out_specs=pl.BlockSpec((TB, TC), lambda b, c: (b, c)),
        ),
        compiler_params=pltpu.CompilerParams(
            dimension_semantics=("parallel", "parallel"),
            vmem_limit_bytes=vmem_limit,
        ),
    )(x2, pos2)

    return out2.reshape(B, S, E)


if __name__ == "__main__":
    # Module config (small, consistent with the PyTorch forward):
    feature_num = 16   # max positions in the learnable table
    embed_dim = 32
    batch = 2
    seq_len = 8        # x.size(1) <= feature_num

    key = jax.random.PRNGKey(0)
    k_x, k_pos, k_x2, k_x3 = jax.random.split(key, 4)

    # Deterministic "parameter": normal(mean=0, std=0.02), like nn.init.normal_
    pos_embedding = 0.02 * jax.random.normal(
        k_pos, (1, feature_num, embed_dim), dtype=jnp.float32
    )
    x = jax.random.normal(k_x, (batch, seq_len, embed_dim), dtype=jnp.float32)

    # Small case: force the Pallas path (auto-dispatch would use plain XLA).
    out = learnable_positional_encoding(x, pos_embedding, min_pallas_bytes=0)
    out = jax.block_until_ready(out)
    ref = x + pos_embedding[:, :seq_len, :]
    assert out.shape == (batch, seq_len, embed_dim)
    assert jnp.allclose(out, ref, atol=1e-6), "mismatch vs reference (small)"

    # Ragged batch tiling: B not a multiple of TB -> masked edge block (no pad).
    big_batch = 4100
    xb = jax.random.normal(k_x2, (big_batch, seq_len, embed_dim), dtype=jnp.float32)
    outb = learnable_positional_encoding(
        xb, pos_embedding, min_pallas_bytes=0, target_tile_bytes=256 * 1024)
    outb = jax.block_until_ready(outb)
    refb = xb + pos_embedding[:, :seq_len, :]
    assert outb.shape == (big_batch, seq_len, embed_dim)
    assert jnp.allclose(outb, refb, atol=1e-6), "mismatch vs reference (ragged)"

    # Large-row path: second grid axis over S*E (column tiling).
    S2, E2 = 16, 1024
    pos_big = 0.02 * jax.random.normal(k_pos, (1, S2, E2), dtype=jnp.float32)
    xc = jax.random.normal(k_x3, (4, S2, E2), dtype=jnp.float32)
    outc = learnable_positional_encoding(
        xc, pos_big, min_pallas_bytes=0, target_tile_bytes=128 * 1024)
    outc = jax.block_until_ready(outc)
    refc = xc + pos_big
    assert jnp.allclose(outc, refc, atol=1e-6), "mismatch vs reference (col-tiled)"

    print("KERNEL_OK")
</pallas_src>

<mosaic_0001>
module attributes {stable_mosaic.version = 11 : i64} {
  func.func @_add_pos_kernel(%arg0: i32, %arg1: i32, %arg2: memref<2x256xf32, #tpu.memory_space<vmem>>, %arg3: memref<1x256xf32, #tpu.memory_space<vmem>>, %arg4: memref<2x256xf32, #tpu.memory_space<vmem>>) attributes {dimension_semantics = [#tpu.dimension_semantics<parallel>, #tpu.dimension_semantics<parallel>], iteration_bounds = array<i64: 1, 1>, scalar_prefetch = 0 : i64, scratch_operands = 0 : i64, tpu.core_type = #tpu.core_type<tc>, window_params = [{transform_indices = @transform_0, window_bounds = array<i64: 2, 256>}, {transform_indices = @transform_1, window_bounds = array<i64: 1, 256>}, {transform_indices = @transform_2, window_bounds = array<i64: 2, 256>}]} {
    %c0 = arith.constant 0 : index
    %c0_0 = arith.constant 0 : index
    %0 = vector.load %arg2[%c0, %c0_0] : memref<2x256xf32, #tpu.memory_space<vmem>>, vector<2x256xf32>
    %c0_1 = arith.constant 0 : index
    %c0_2 = arith.constant 0 : index
    %1 = vector.load %arg3[%c0_1, %c0_2] : memref<1x256xf32, #tpu.memory_space<vmem>>, vector<1x256xf32>
    %2 = vector.broadcast %1 : vector<1x256xf32> to vector<2x256xf32>
    %3 = arith.addf %0, %2 : vector<2x256xf32>
    %c0_3 = arith.constant 0 : index
    %c0_4 = arith.constant 0 : index
    %4 = vector.load %arg4[%c0_3, %c0_4] : memref<2x256xf32, #tpu.memory_space<vmem>>, vector<2x256xf32>
    tpu.vector_store %arg4[%c0_3, %c0_4], %3 {strides = array<i32>} : memref<2x256xf32, #tpu.memory_space<vmem>>, vector<2x256xf32>,
    return
  }
  func.func @transform_0(%arg0: i32, %arg1: i32) -> (i32, i32) {
    %c0_i32 = arith.constant 0 : i32
    return %arg0, %arg1 : i32, i32
  }
  func.func @transform_1(%arg0: i32, %arg1: i32) -> (i32, i32) {
    %c0_i32 = arith.constant 0 : i32
    %c0_i32_0 = arith.constant 0 : i32
    return %c0_i32, %arg1 : i32, i32
  }
  func.func @transform_2(%arg0: i32, %arg1: i32) -> (i32, i32) {
    %c0_i32 = arith.constant 0 : i32
    return %arg0, %arg1 : i32, i32
  }
}

</mosaic_0001>

<bundles_post_ra>
// kernel: tpu_custom_call.1
= control target key start
LH: loop header
LB: loop body
LE: loop exit
PB: predicated region body
PF: predicated region fallthrough
CT: control target
= control target key end

     0   :  { %7 = vsyncpa [#allocation3], 0  ;;  %s157_s0 = inlined_call_operand.hbm [shape: f32[2,256], index: 0, kind: input, shape index: {}]   ;;  %s158_s1 = inlined_call_operand.vmem [shape: f32[1,256], index: 1, kind: input, shape index: {}]   ;;  %s159_s2 = inlined_call_operand.hbm [shape: f32[2,256], index: 2, kind: output, shape index: {}]  }
   0x1   :  { %8 = vsyncpa [#allocation4], 0  ;;  %s112_s9 = smov [#allocation2]   ;;  %s64_s13 = scalar_lea.hbm %s157_s0, 64 }
   0x2   :  { %s15_s10 = sshll.u32 %s112_s9, 4  ;;  %p65_p0 = scmp.ne.s32.totalorder %s157_s0, %s64_s13  ;;  %s16_s10 = int_to_ptr.vmem [resolvable:$true] %s15_s10 }
   0x3   :  { %p68_p1 = scmp.lt.u32.totalorder %s64_s13, %s157_s0 }
   0x5   :  { %p70_p2 = pnand %p68_p1, %p65_p0 }
   0x7   :  { %73 = shalt.err (!%p70_p2)
}
   0x8   :  { %s74_s18 = scalar_lea.vmem %s16_s10, 64  ;;  %p79_p4 = scmp.lt.s32.totalorder %s16_s10, %s16_s10 }
   0x9   :  { %p75_p3 = scmp.ne.s32.totalorder %s16_s10, %s74_s18  ;;  %p80_p5 = scmp.lt.s32.totalorder %s74_s18, %s74_s18 }
   0xb   :  { %p81_p6 = por %p80_p5, %p79_p4 }
   0xd   :  { %p82_p7 = pnand %p81_p6, %p75_p3 }
   0xf   :  { %85 = shalt.err (!%p82_p7)
}
  0x10   :  { %18 = dma.hbm_to_vmem [thread:$0]  %s157_s0, 64, %s16_s10, [#allocation3]  }
  0x11   :  { %108 = dma.done.wait [#allocation3], 64  }
  0x12   :  { %109 = vsyncadd [#allocation3], 4294967232  ;;  %v27_v0 = vlaneseq  ;;  %v113_v1 = vmov 1983009808   ;;  %v25_v7 = vld [vmem:[%s158_s1] sm:$0x3] }
  0x13   :  { %v37_v2 = vunpack.c.l.s4 %v113_v1  ;;  %v24_v12 = vld [vmem:[#allocation2] sm:$0xf]  ;;  %s114_s23 = smov [#allocation5]  }
  0x14   :  { %v28_v3 = vshrl.u32 %v27_v0, 7  ;;  %s52_s0 = sshll.u32 %s114_s23, 4  ;;  %s53_s0 = int_to_ptr.vmem [resolvable:$true] %s52_s0 }
  0x15   :  { %v38_v6 = vunpack.c.0.s8 %v37_v2  ;;  %s86_s24 = scalar_lea.vmem %s53_s0, 64  ;;  %p91_p9 = scmp.lt.s32.totalorder %s53_s0, %s53_s0 }
  0x16   :  { %v29_v4 = vsub.s32 0, %v28_v3  ;;  %v33_v5 = vsub.s32 1, %v28_v3  ;;  %p87_p8 = scmp.ne.s32.totalorder %s53_s0, %s86_s24  ;;  %p92_p10 = scmp.lt.s32.totalorder %s86_s24, %s86_s24 }
  0x17   :  { %v41_v10 = vsub.s32 %v38_v6, %v28_v3 }
  0x18   :  { %v30_v8 = vrot.slane %v25_v7, %v29_v4  ;;  %v34_v9 = vrot.slane %v25_v7, %v33_v5  ;;  %p93_p11 = por %p92_p10, %p91_p9 }
  0x1a   :  { %v35_v11 = vcombine.low %v30_v8, %v34_v9  ;;  %p94_p12 = pnand %p93_p11, %p87_p8 }
  0x1c   :  { %v42_v13 = vrot.slane %v35_v11, %v41_v10 }
  0x1e   :  { %v44_v14 = vadd.f32 %v42_v13, %v24_v12 }
  0x20   :  { %45 = vst [vmem:[#allocation5] sm:$0xf] %v44_v14 }
  0x21   :  { %97 = shalt.err (!%p94_p12)
}
  0x22   :  { %s98_s26 = scalar_lea.hbm %s159_s2, 64 }
  0x23   :  { %p99_p13 = scmp.ne.s32.totalorder %s159_s2, %s98_s26  ;;  %p102_p0 = scmp.lt.u32.totalorder %s98_s26, %s159_s2 }
  0x25   :  { %p104_p1 = pnand %p102_p0, %p99_p13 }
  0x27   :  { %107 = shalt.err (!%p104_p1)
}
  0x28   :  { %55 = dma.vmem_to_hbm [thread:$0]  %s53_s0, 64, %s159_s2, [#allocation4]  }
  0x29   :  { %110 = dma.done.wait [#allocation4], 64  }
  0x2a   :  { %111 = vsyncadd [#allocation4], 4294967232 }
  0x2b   :  { %59 = vsyncpa [#allocation3], 1 }
  0x2c   :  { %60 = vsyncpa [#allocation4], 1 }

</bundles_post_ra>
